<compile_context>
chip_gen: v7x
topology: tpu7x:2x2x1
jax: 0.10.0
libtpu: 0.0.40
codegen_flags: <defaults>
</compile_context>

<pallas_src>
import math
import functools

import jax
import jax.numpy as jnp
from jax.experimental import pallas as pl
from jax.experimental.pallas import tpu as pltpu


# ------------------------------ tiling helpers ------------------------------ #

TM_TARGET = 512    # batch tile        (multiple of 8)
TN_TARGET = 512    # out-feature tile  (multiple of 128 -> lane-dense stores)
TK_TARGET = 1024   # in-feature tile   (multiple of 128)

VMEM_LIMIT_BYTES = 48 * 1024 * 1024   # <= v7x 64 MiB physical; fine on v5e/v6e


def _round_up(v, m):
    return ((v + m - 1) // m) * m


def _pick_tile(dim, unit, target, max_overhead=0.125):
    """Pick (tile, padded_dim): tile is a multiple of `unit`, <= target, and the
    dim is padded UP to a tile multiple with bounded overhead (instead of
    shrinking the tile to divide the dim, which explodes grid-step count)."""
    dim_u = _round_up(dim, unit)
    if dim_u <= target:
        return dim_u, dim_u                      # single tile
    t = (target // unit) * unit
    while t > unit:
        padded = _round_up(dim, t)
        if (padded - dim) <= max_overhead * dim:
            return t, padded
        t -= unit
    return unit, dim_u                           # fallback: minimal padding


def _pad2d(a, rows, cols):
    r, c = a.shape
    if r == rows and c == cols:
        return a
    return jnp.pad(a, ((0, rows - r), (0, cols - c)))


# ----------------------------- Pallas kernels ------------------------------ #

def _train_kernel(x_ref, mu_wt_ref, logsig2_ref, bias_ref, eps_ref, o_ref,
                  acc_mu_ref, acc_var_ref):
    """Training branch (local reparameterization), one (i, j, k) grid step.

    acc_mu  += x @ mu_w            (bf16 MXU operands, f32 accumulation)
    acc_var += (x*x) @ exp(clamp(logsig2))
    last k:  out = acc_mu + bias + sqrt(acc_var + 1e-8) * eps
    """
    k = pl.program_id(2)

    @pl.when(k == 0)
    def _():
        acc_mu_ref[...] = jnp.zeros_like(acc_mu_ref)
        acc_var_ref[...] = jnp.zeros_like(acc_var_ref)

    # Elementwise math in f32 (v5e VPU/EUP have no bf16 datapath); cast only at
    # the MXU operand boundary.
    x = x_ref[...].astype(jnp.float32)
    s2 = jnp.exp(jnp.clip(logsig2_ref[...].astype(jnp.float32), -11.0, 11.0))

    acc_mu_ref[...] += jnp.dot(
        x.astype(jnp.bfloat16), mu_wt_ref[...].astype(jnp.bfloat16),
        preferred_element_type=jnp.float32)
    acc_var_ref[...] += jnp.dot(
        (x * x).astype(jnp.bfloat16), s2.astype(jnp.bfloat16),
        preferred_element_type=jnp.float32)

    @pl.when(k == pl.num_programs(2) - 1)
    def _():
        mu_out = acc_mu_ref[...] + bias_ref[...]
        var_out = acc_var_ref[...] + 1e-8
        o_ref[...] = (mu_out + jnp.sqrt(var_out) * eps_ref[...]).astype(o_ref.dtype)


def _linear_kernel(x_ref, w_ref, bias_ref, o_ref, acc_ref, *, out_add=0.0):
    """Plain linear: out = x @ W + bias (+ out_add). Eval/map and eval/sample."""
    k = pl.program_id(2)

    @pl.when(k == 0)
    def _():
        acc_ref[...] = jnp.zeros_like(acc_ref)

    acc_ref[...] += jnp.dot(
        x_ref[...].astype(jnp.bfloat16), w_ref[...].astype(jnp.bfloat16),
        preferred_element_type=jnp.float32)

    @pl.when(k == pl.num_programs(2) - 1)
    def _():
        res = acc_ref[...] + bias_ref[...]
        if out_add:
            res = res + out_add
        o_ref[...] = res.astype(o_ref.dtype)


def _sample_w_kernel(mu_ref, logsig2_ref, rand_ref, o_ref):
    """Elementwise: W = mu + sqrt(exp(clamp(logsig2))) * random. Built once, cached."""
    s2 = jnp.exp(jnp.clip(logsig2_ref[...].astype(jnp.float32), -11.0, 11.0))
    w = mu_ref[...].astype(jnp.float32) + jnp.sqrt(s2) * rand_ref[...].astype(jnp.float32)
    o_ref[...] = w.astype(o_ref.dtype)


# ---------------------------- pallas_call wrappers -------------------------- #

def _elementwise_call(kernel, out_dtype, tiles, *arrays):
    tr, tc = tiles
    K, N = arrays[0].shape
    spec = pl.BlockSpec((tr, tc), lambda i, j: (i, j))
    return pl.pallas_call(
        kernel,
        out_shape=jax.ShapeDtypeStruct((K, N), out_dtype),
        grid_spec=pltpu.PrefetchScalarGridSpec(
            num_scalar_prefetch=0,
            grid=(K // tr, N // tc),
            in_specs=[spec] * len(arrays),
            out_specs=spec,
        ),
        compiler_params=pltpu.CompilerParams(
            dimension_semantics=("parallel", "parallel"),
            vmem_limit_bytes=VMEM_LIMIT_BYTES,
        ),
    )(*arrays)


def _vb_linear_pallas(x_pad, w_pad, bias_pad, *, out_add, tm, tk, tn, out_dtype):
    M, K = x_pad.shape
    N = w_pad.shape[1]
    grid = (M // tm, N // tn, K // tk)
    cost = pl.CostEstimate(
        flops=2 * M * K * N,
        transcendentals=0,
        bytes_accessed=4 * M * K + 2 * K * N + 4 * M * N + 4 * N,
    )
    kernel = functools.partial(_linear_kernel, out_add=out_add)
    return pl.pallas_call(
        kernel,
        out_shape=jax.ShapeDtypeStruct((M, N), out_dtype),
        grid_spec=pltpu.PrefetchScalarGridSpec(
            num_scalar_prefetch=0,
            grid=grid,
            in_specs=[
                pl.BlockSpec((tm, tk), lambda i, j, k: (i, k)),
                pl.BlockSpec((tk, tn), lambda i, j, k: (k, j)),
                pl.BlockSpec((1, tn), lambda i, j, k: (0, j)),
            ],
            out_specs=pl.BlockSpec((tm, tn), lambda i, j, k: (i, j)),
            scratch_shapes=[pltpu.VMEM((tm, tn), jnp.float32)],
        ),
        compiler_params=pltpu.CompilerParams(
            dimension_semantics=("parallel", "parallel", "arbitrary"),
            vmem_limit_bytes=VMEM_LIMIT_BYTES,
        ),
        cost_estimate=cost,
    )(x_pad, w_pad, bias_pad)


def _vb_train_pallas(x_pad, mu_wt_pad, logsig2_pad, bias_pad, eps_pad, *,
                     tm, tk, tn, out_dtype):
    M, K = x_pad.shape
    N = mu_wt_pad.shape[1]
    grid = (M // tm, N // tn, K // tk)
    cost = pl.CostEstimate(
        flops=4 * M * K * N,
        transcendentals=K * N * grid[0],
        bytes_accessed=4 * M * K + 2 * K * N + 4 * K * N + 2 * 4 * M * N + 4 * N,
    )
    return pl.pallas_call(
        _train_kernel,
        out_shape=jax.ShapeDtypeStruct((M, N), out_dtype),
        grid_spec=pltpu.PrefetchScalarGridSpec(
            num_scalar_prefetch=0,
            grid=grid,
            in_specs=[
                pl.BlockSpec((tm, tk), lambda i, j, k: (i, k)),   # x
                pl.BlockSpec((tk, tn), lambda i, j, k: (k, j)),   # mu_w (bf16, transposed)
                pl.BlockSpec((tk, tn), lambda i, j, k: (k, j)),   # logsig2 (f32)
                pl.BlockSpec((1, tn), lambda i, j, k: (0, j)),    # bias
                pl.BlockSpec((tm, tn), lambda i, j, k: (i, j)),   # eps (fetched once/ij)
            ],
            out_specs=pl.BlockSpec((tm, tn), lambda i, j, k: (i, j)),
            scratch_shapes=[pltpu.VMEM((tm, tn), jnp.float32),
                            pltpu.VMEM((tm, tn), jnp.float32)],
        ),
        compiler_params=pltpu.CompilerParams(
            dimension_semantics=("parallel", "parallel", "arbitrary"),
            vmem_limit_bytes=VMEM_LIMIT_BYTES,
        ),
        cost_estimate=cost,
    )(x_pad, mu_wt_pad, logsig2_pad, bias_pad, eps_pad)


# ------------------------------- Module glue ------------------------------- #

class VBLinear:
    """JAX/Pallas port of the PyTorch VBLinear module (forward pass).

    Weights are stored pre-transposed as (n_in, n_out) so kernels compute x @ W
    with lane-dense outputs and no per-call HBM transpose; padded copies (mu in
    bf16, logsig2 in f32) are built once at parameter-set time.
    """

    def __init__(self, in_features, out_features, prior_prec=1.0, _map=False,
                 std_init=-9, key=None):
        self.n_in = in_features
        self.n_out = out_features
        self.map = _map
        self.prior_prec = prior_prec
        self.std_init = std_init
        self.random = None                 # persistent eval noise (n_in, n_out)
        self._sampled_wt_pad = None        # cached sampled weight (padded, bf16)

        # K/N tiles and padded weight dims are fixed at construction time.
        self._tk, self._K_pad = _pick_tile(in_features, 128, TK_TARGET)
        self._tn, self._N_pad = _pick_tile(out_features, 128, TN_TARGET)

        if key is None:
            key = jax.random.PRNGKey(0)
        self.reset_parameters(key)

    def reset_parameters(self, key):
        k_mu, k_sig = jax.random.split(key)
        stdv = 1.0 / math.sqrt(self.n_in)
        self.mu_wt = stdv * jax.random.normal(k_mu, (self.n_in, self.n_out), jnp.float32)
        self.logsig2_wt = self.std_init + 0.001 * jax.random.normal(
            k_sig, (self.n_in, self.n_out), jnp.float32)
        self.bias = jnp.zeros((self.n_out,), jnp.float32)
        self.random = None
        self._refresh_padded()

    def _refresh_padded(self):
        # mu streamed to the MXU in bf16 anyway -> store padded copy in bf16.
        self._mu_wt_pad = _pad2d(self.mu_wt, self._K_pad, self._N_pad).astype(jnp.bfloat16)
        # logsig2 kept f32: its ~1e-3 structure would be destroyed by bf16 and it
        # feeds exp(clamp(.)) which must run in f32.
        self._logsig2_wt_pad = _pad2d(self.logsig2_wt, self._K_pad, self._N_pad)
        self._bias_pad = _pad2d(self.bias.reshape(1, self.n_out), 1, self._N_pad)
        self._sampled_wt_pad = None

    def KL(self):
        logsig2 = jnp.clip(self.logsig2_wt, -11.0, 11.0)
        return 0.5 * jnp.sum(
            self.prior_prec * (self.mu_wt ** 2 + jnp.exp(logsig2))
            - logsig2 - 1.0 - jnp.log(self.prior_prec))

    def forward(self, x, *, training=True, rng_key=None, eps=None):
        orig_shape = x.shape
        x2d = x.reshape(-1, self.n_in)
        M = x2d.shape[0]
        out_dtype = x.dtype

        tm, M_pad = _pick_tile(M, 8, TM_TARGET)
        x_pad = _pad2d(x2d, M_pad, self._K_pad)

        if training:
            if eps is not None:
                eps_pad = _pad2d(eps.reshape(M, self.n_out).astype(jnp.float32),
                                 M_pad, self._N_pad)
            else:
                if rng_key is None:
                    rng_key = jax.random.PRNGKey(42)
                # Drawn directly at padded shape (no extra pad pass).
                eps_pad = jax.random.normal(rng_key, (M_pad, self._N_pad), jnp.float32)

            out = _vb_train_pallas(
                x_pad, self._mu_wt_pad, self._logsig2_wt_pad, self._bias_pad, eps_pad,
                tm=tm, tk=self._tk, tn=self._tn, out_dtype=out_dtype)

        elif self.map:
            out = _vb_linear_pallas(
                x_pad, self._mu_wt_pad, self._bias_pad, out_add=0.0,
                tm=tm, tk=self._tk, tn=self._tn, out_dtype=out_dtype)

        else:
            if self._sampled_wt_pad is None:
                if self.random is None:
                    if rng_key is None:
                        rng_key = jax.random.PRNGKey(7)
                    self.random = jax.random.normal(
                        rng_key, (self.n_in, self.n_out), jnp.float32)
                rand_pad = _pad2d(self.random, self._K_pad, self._N_pad)
                # Sampled weight is constant across eval calls -> built once (one
                # HBM-roofline elementwise pass, bf16 output), then cached.
                self._sampled_wt_pad = _elementwise_call(
                    _sample_w_kernel, jnp.bfloat16, (self._tk, self._tn),
                    self._mu_wt_pad, self._logsig2_wt_pad, rand_pad)
            out = _vb_linear_pallas(
                x_pad, self._sampled_wt_pad, self._bias_pad, out_add=1e-8,
                tm=tm, tk=self._tk, tn=self._tn, out_dtype=out_dtype)

        out = out[:M, :self.n_out]
        return out.reshape(*orig_shape[:-1], self.n_out)


# ------------------------------- References --------------------------------- #
# The kernel feeds the MXU bf16 operands with f32 accumulation; the "emulated"
# references apply exactly the same operand rounding so they match tightly.

def _bf16(a):
    return a.astype(jnp.bfloat16).astype(jnp.float32)


def _dot_hi(a, b):
    return jnp.dot(a, b, precision=jax.lax.Precision.HIGHEST)


def _ref_train_f32(x, mu_wt, logsig2_wt, bias, eps):
    s2 = jnp.exp(jnp.clip(logsig2_wt, -11.0, 11.0))
    mu_out = _dot_hi(x, mu_wt) + bias
    var_out = _dot_hi(x ** 2, s2) + 1e-8
    return mu_out + jnp.sqrt(var_out) * eps


def _ref_train_bf16(x, mu_wt, logsig2_wt, bias, eps):
    s2 = jnp.exp(jnp.clip(logsig2_wt, -11.0, 11.0))
    mu_out = _dot_hi(_bf16(x), _bf16(mu_wt)) + bias
    var_out = _dot_hi(_bf16(x ** 2), _bf16(s2)) + 1e-8
    return mu_out + jnp.sqrt(var_out) * eps


def _ref_eval_sample_bf16(x, mu_wt, logsig2_wt, bias, rand_t):
    s2 = jnp.exp(jnp.clip(logsig2_wt, -11.0, 11.0))
    w = _bf16(_bf16(mu_wt) + jnp.sqrt(s2) * rand_t)   # kernel stores mu & W in bf16
    return _dot_hi(_bf16(x), w) + bias + 1e-8


def _ref_map_bf16(x, mu_wt, bias):
    return _dot_hi(_bf16(x), _bf16(mu_wt)) + bias


# --------------------------------- Main ------------------------------------ #

if __name__ == "__main__":
    key = jax.random.PRNGKey(0)
    k_param, k_x, k_eps, k_rand = jax.random.split(key, 4)

    # Lane/sublane-aligned shapes (no internal padding path).
    batch, n_in, n_out = 8, 128, 128
    layer = VBLinear(n_in, n_out, key=k_param)
    x = jax.random.normal(k_x, (batch, n_in), jnp.float32)

    # training branch (local reparameterization), deterministic eps for checking
    eps = jax.random.normal(k_eps, (batch, n_out), jnp.float32)
    out_train = jax.block_until_ready(layer.forward(x, training=True, eps=eps))
    assert out_train.shape == (batch, n_out)
    ref_bf = _ref_train_bf16(x, layer.mu_wt, layer.logsig2_wt, layer.bias, eps)
    assert jnp.allclose(out_train, ref_bf, atol=5e-4, rtol=5e-3)
    ref_f32 = _ref_train_f32(x, layer.mu_wt, layer.logsig2_wt, layer.bias, eps)
    assert jnp.allclose(out_train, ref_f32, atol=5e-2, rtol=5e-2)   # bf16 MXU tolerance

    # eval branch with sampled weight (built once, cached)
    out_eval = jax.block_until_ready(layer.forward(x, training=False, rng_key=k_rand))
    ref_eval = _ref_eval_sample_bf16(x, layer.mu_wt, layer.logsig2_wt, layer.bias,
                                     layer.random)
    assert jnp.allclose(out_eval, ref_eval, atol=5e-4, rtol=5e-3)
    # second eval call reuses the cached sampled weight
    out_eval2 = jax.block_until_ready(layer.forward(x, training=False))
    assert jnp.allclose(out_eval2, out_eval, atol=1e-6, rtol=1e-6)

    # eval branch with MAP weights
    layer.map = True
    out_map = jax.block_until_ready(layer.forward(x, training=False))
    assert jnp.allclose(out_map, _ref_map_bf16(x, layer.mu_wt, layer.bias),
                        atol=5e-4, rtol=5e-3)
    layer.map = False

    # Non-aligned shapes exercise the padding path.
    batch2, n_in2, n_out2 = 5, 40, 24
    layer2 = VBLinear(n_in2, n_out2, key=jax.random.PRNGKey(3))
    x2 = jax.random.normal(jax.random.PRNGKey(4), (batch2, n_in2), jnp.float32)
    eps2 = jax.random.normal(jax.random.PRNGKey(5), (batch2, n_out2), jnp.float32)
    out2 = jax.block_until_ready(layer2.forward(x2, training=True, eps=eps2))
    assert out2.shape == (batch2, n_out2)
    ref2 = _ref_train_bf16(x2, layer2.mu_wt, layer2.logsig2_wt, layer2.bias, eps2)
    assert jnp.allclose(out2, ref2, atol=5e-4, rtol=5e-3)
    out2e = jax.block_until_ready(layer2.forward(x2, training=False,
                                                 rng_key=jax.random.PRNGKey(6)))
    ref2e = _ref_eval_sample_bf16(x2, layer2.mu_wt, layer2.logsig2_wt, layer2.bias,
                                  layer2.random)
    assert jnp.allclose(out2e, ref2e, atol=5e-4, rtol=5e-3)

    print("KERNEL_OK")
</pallas_src>

<mosaic_0001>
module attributes {stable_mosaic.version = 11 : i64} {
  func.func @_train_kernel(%arg0: i32, %arg1: i32, %arg2: i32, %arg3: memref<8x128xf32, #tpu.memory_space<vmem>>, %arg4: memref<128x128xbf16, #tpu.memory_space<vmem>>, %arg5: memref<128x128xf32, #tpu.memory_space<vmem>>, %arg6: memref<1x128xf32, #tpu.memory_space<vmem>>, %arg7: memref<8x128xf32, #tpu.memory_space<vmem>>, %arg8: memref<8x128xf32, #tpu.memory_space<vmem>>, %arg9: memref<8x128xf32, #tpu.memory_space<vmem>>, %arg10: memref<8x128xf32, #tpu.memory_space<vmem>>) attributes {dimension_semantics = [#tpu.dimension_semantics<parallel>, #tpu.dimension_semantics<parallel>, #tpu.dimension_semantics<arbitrary>], iteration_bounds = array<i64: 1, 1, 1>, scalar_prefetch = 0 : i64, scratch_operands = 2 : i64, tpu.core_type = #tpu.core_type<tc>, window_params = [{transform_indices = @transform_0, window_bounds = array<i64: 8, 128>}, {transform_indices = @transform_1, window_bounds = array<i64: 128, 128>}, {transform_indices = @transform_2, window_bounds = array<i64: 128, 128>}, {transform_indices = @transform_3, window_bounds = array<i64: 1, 128>}, {transform_indices = @transform_4, window_bounds = array<i64: 8, 128>}, {transform_indices = @transform_5, window_bounds = array<i64: 8, 128>}]} {
    %c0_i32 = arith.constant 0 : i32
    %0 = arith.cmpi eq, %arg2, %c0_i32 : i32
    %1 = arith.extui %0 : i1 to i32
    %c0_i32_0 = arith.constant 0 : i32
    %2 = arith.cmpi ne, %1, %c0_i32_0 : i32
    scf.if %2 {
      %cst_19 = arith.constant 0.000000e+00 : f32
      %26 = vector.broadcast %cst_19 : f32 to vector<8x128xf32>
      %c0_20 = arith.constant 0 : index
      %c0_21 = arith.constant 0 : index
      %27 = vector.load %arg9[%c0_20, %c0_21] : memref<8x128xf32, #tpu.memory_space<vmem>>, vector<8x128xf32>
      tpu.vector_store %arg9[%c0_20, %c0_21], %26 {strides = array<i32>} : memref<8x128xf32, #tpu.memory_space<vmem>>, vector<8x128xf32>,
      %cst_22 = arith.constant 0.000000e+00 : f32
      %28 = vector.broadcast %cst_22 : f32 to vector<8x128xf32>
      %c0_23 = arith.constant 0 : index
      %c0_24 = arith.constant 0 : index
      %29 = vector.load %arg10[%c0_23, %c0_24] : memref<8x128xf32, #tpu.memory_space<vmem>>, vector<8x128xf32>
      tpu.vector_store %arg10[%c0_23, %c0_24], %28 {strides = array<i32>} : memref<8x128xf32, #tpu.memory_space<vmem>>, vector<8x128xf32>,
    } else {
    }
    %c0 = arith.constant 0 : index
    %c0_1 = arith.constant 0 : index
    %3 = vector.load %arg3[%c0, %c0_1] : memref<8x128xf32, #tpu.memory_space<vmem>>, vector<8x128xf32>
    %c0_2 = arith.constant 0 : index
    %c0_3 = arith.constant 0 : index
    %4 = vector.load %arg5[%c0_2, %c0_3] : memref<128x128xf32, #tpu.memory_space<vmem>>, vector<128x128xf32>
    %cst = arith.constant -1.100000e+01 : f32
    %cst_4 = arith.constant 1.100000e+01 : f32
    %5 = vector.broadcast %cst : f32 to vector<128x128xf32>
    %6 = arith.maximumf %5, %4 : vector<128x128xf32>
    %7 = vector.broadcast %cst_4 : f32 to vector<128x128xf32>
    %8 = arith.minimumf %7, %6 : vector<128x128xf32>
    %9 = math.exp %8 : vector<128x128xf32>
    %c0_5 = arith.constant 0 : index
    %c0_6 = arith.constant 0 : index
    %10 = vector.load %arg9[%c0_5, %c0_6] : memref<8x128xf32, #tpu.memory_space<vmem>>, vector<8x128xf32>
    %11 = arith.truncf %3 : vector<8x128xf32> to vector<8x128xbf16>
    %c0_7 = arith.constant 0 : index
    %c0_8 = arith.constant 0 : index
    %12 = vector.load %arg4[%c0_7, %c0_8] : memref<128x128xbf16, #tpu.memory_space<vmem>>, vector<128x128xbf16>
    %cst_9 = arith.constant dense<0.000000e+00> : vector<8x128xf32>
    %13 = tpu.matmul %11, %12, %cst_9 {dimension_numbers = #tpu.dot_dimension_numbers<[1], [0], [0], [1], [0, 0, 1, 1], [], []>} : vector<8x128xbf16>, vector<128x128xbf16>, vector<8x128xf32> -> vector<8x128xf32>
    %14 = arith.addf %10, %13 : vector<8x128xf32>
    %c0_10 = arith.constant 0 : index
    %c0_11 = arith.constant 0 : index
    %15 = vector.load %arg9[%c0_10, %c0_11] : memref<8x128xf32, #tpu.memory_space<vmem>>, vector<8x128xf32>
    tpu.vector_store %arg9[%c0_10, %c0_11], %14 {strides = array<i32>} : memref<8x128xf32, #tpu.memory_space<vmem>>, vector<8x128xf32>,
    %c0_12 = arith.constant 0 : index
    %c0_13 = arith.constant 0 : index
    %16 = vector.load %arg10[%c0_12, %c0_13] : memref<8x128xf32, #tpu.memory_space<vmem>>, vector<8x128xf32>
    %17 = arith.mulf %3, %3 : vector<8x128xf32>
    %18 = arith.truncf %17 : vector<8x128xf32> to vector<8x128xbf16>
    %19 = arith.truncf %9 : vector<128x128xf32> to vector<128x128xbf16>
    %cst_14 = arith.constant dense<0.000000e+00> : vector<8x128xf32>
    %20 = tpu.matmul %18, %19, %cst_14 {dimension_numbers = #tpu.dot_dimension_numbers<[1], [0], [0], [1], [0, 0, 1, 1], [], []>} : vector<8x128xbf16>, vector<128x128xbf16>, vector<8x128xf32> -> vector<8x128xf32>
    %21 = arith.addf %16, %20 : vector<8x128xf32>
    %c0_15 = arith.constant 0 : index
    %c0_16 = arith.constant 0 : index
    %22 = vector.load %arg10[%c0_15, %c0_16] : memref<8x128xf32, #tpu.memory_space<vmem>>, vector<8x128xf32>
    tpu.vector_store %arg10[%c0_15, %c0_16], %21 {strides = array<i32>} : memref<8x128xf32, #tpu.memory_space<vmem>>, vector<8x128xf32>,
    %c0_i32_17 = arith.constant 0 : i32
    %23 = arith.cmpi eq, %arg2, %c0_i32_17 : i32
    %24 = arith.extui %23 : i1 to i32
    %c0_i32_18 = arith.constant 0 : i32
    %25 = arith.cmpi ne, %24, %c0_i32_18 : i32
    scf.if %25 {
      %c0_19 = arith.constant 0 : index
      %c0_20 = arith.constant 0 : index
      %26 = vector.load %arg9[%c0_19, %c0_20] : memref<8x128xf32, #tpu.memory_space<vmem>>, vector<8x128xf32>
      %c0_21 = arith.constant 0 : index
      %c0_22 = arith.constant 0 : index
      %27 = vector.load %arg6[%c0_21, %c0_22] : memref<1x128xf32, #tpu.memory_space<vmem>>, vector<1x128xf32>
      %28 = vector.broadcast %27 : vector<1x128xf32> to vector<8x128xf32>
      %29 = arith.addf %26, %28 : vector<8x128xf32>
      %c0_23 = arith.constant 0 : index
      %c0_24 = arith.constant 0 : index
      %30 = vector.load %arg10[%c0_23, %c0_24] : memref<8x128xf32, #tpu.memory_space<vmem>>, vector<8x128xf32>
      %cst_25 = arith.constant 9.99999993E-9 : f32
      %31 = vector.broadcast %cst_25 : f32 to vector<8x128xf32>
      %32 = arith.addf %30, %31 : vector<8x128xf32>
      %33 = math.sqrt %32 : vector<8x128xf32>
      %c0_26 = arith.constant 0 : index
      %c0_27 = arith.constant 0 : index
      %34 = vector.load %arg7[%c0_26, %c0_27] : memref<8x128xf32, #tpu.memory_space<vmem>>, vector<8x128xf32>
      %35 = arith.mulf %33, %34 : vector<8x128xf32>
      %36 = arith.addf %29, %35 : vector<8x128xf32>
      %c0_28 = arith.constant 0 : index
      %c0_29 = arith.constant 0 : index
      %37 = vector.load %arg8[%c0_28, %c0_29] : memref<8x128xf32, #tpu.memory_space<vmem>>, vector<8x128xf32>
      tpu.vector_store %arg8[%c0_28, %c0_29], %36 {strides = array<i32>} : memref<8x128xf32, #tpu.memory_space<vmem>>, vector<8x128xf32>,
    } else {
    }
    return
  }
  func.func @transform_0(%arg0: i32, %arg1: i32, %arg2: i32) -> (i32, i32) {
    %c0_i32 = arith.constant 0 : i32
    return %arg0, %arg2 : i32, i32
  }
  func.func @transform_1(%arg0: i32, %arg1: i32, %arg2: i32) -> (i32, i32) {
    %c0_i32 = arith.constant 0 : i32
    return %arg2, %arg1 : i32, i32
  }
  func.func @transform_2(%arg0: i32, %arg1: i32, %arg2: i32) -> (i32, i32) {
    %c0_i32 = arith.constant 0 : i32
    return %arg2, %arg1 : i32, i32
  }
  func.func @transform_3(%arg0: i32, %arg1: i32, %arg2: i32) -> (i32, i32) {
    %c0_i32 = arith.constant 0 : i32
    %c0_i32_0 = arith.constant 0 : i32
    return %c0_i32, %arg1 : i32, i32
  }
  func.func @transform_4(%arg0: i32, %arg1: i32, %arg2: i32) -> (i32, i32) {
    %c0_i32 = arith.constant 0 : i32
    return %arg0, %arg1 : i32, i32
  }
  func.func @transform_5(%arg0: i32, %arg1: i32, %arg2: i32) -> (i32, i32) {
    %c0_i32 = arith.constant 0 : i32
    return %arg0, %arg1 : i32, i32
  }
}

</mosaic_0001>

<bundles_post_ra>
// kernel: tpu_custom_call.1
= control target key start
LH: loop header
LB: loop body
LE: loop exit
PB: predicated region body
PF: predicated region fallthrough
CT: control target
= control target key end

     0   :  { %10 = vsyncpa [#allocation5], 0  ;;  %s691_s0 = inlined_call_operand.hbm [shape: f32[8,128], index: 0, kind: input, shape index: {}]   ;;  %s692_s1 = inlined_call_operand.hbm [shape: bf16[128,128], index: 1, kind: input, shape index: {}]   ;;  %s693_s2 = inlined_call_operand.hbm [shape: f32[128,128], index: 2, kind: input, shape index: {}]   ;;  %s694_s3 = inlined_call_operand.vmem [shape: f32[1,128], index: 3, kind: input, shape index: {}]   ;;  %s695_s4 = inlined_call_operand.vmem [shape: f32[8,128], index: 4, kind: input, shape index: {}]   ;;  %s696_s5 = inlined_call_operand.hbm [shape: f32[8,128], index: 5, kind: output, shape index: {}]  }
   0x1   :  { %11 = vsyncpa [#allocation8], 0 }
   0x2   :  { %12 = vsyncpa [#allocation6], 0  ;;  %s579_s18 = smov [#allocation7]   ;;  %s485_s22 = scalar_lea.hbm %s692_s1, 1024 }
   0x3   :  { %s28_s19 = sshll.u32 %s579_s18, 4  ;;  %p486_p0 = scmp.ne.s32.totalorder %s692_s1, %s485_s22  ;;  %s29_s19 = int_to_ptr.vmem [resolvable:$true] %s28_s19 }
   0x4   :  { %p489_p1 = scmp.lt.u32.totalorder %s485_s22, %s692_s1 }
   0x6   :  { %p491_p2 = pnand %p489_p1, %p486_p0 }
   0x8   :  { %494 = shalt.err (!%p491_p2)
}
   0x9   :  { %s495_s27 = scalar_lea.vmem %s29_s19, 1024  ;;  %p500_p4 = scmp.lt.s32.totalorder %s29_s19, %s29_s19 }
   0xa   :  { %p496_p3 = scmp.ne.s32.totalorder %s29_s19, %s495_s27  ;;  %p501_p5 = scmp.lt.s32.totalorder %s495_s27, %s495_s27 }
   0xc   :  { %p502_p6 = por %p501_p5, %p500_p4 }
   0xe   :  { %p503_p7 = pnand %p502_p6, %p496_p3 }
  0x10   :  { %506 = shalt.err (!%p503_p7)
}
  0x11   :  { %s580_s28 = smov 64   ;;  %s581_s29 = smov 4  }
  0x12   :  { %34 = dma.hbm_to_vmem [thread:$0]  %s692_s1, 1024, %s29_s19, [#allocation8], %s580_s28, %s580_s28, %s581_s29  }
  0x13   :  { %s582_s7 = smov [#allocation4]   ;;  %s583_s9 = smov [#allocation9]  }
  0x14   :  { %s19_s8 = sshll.u32 %s582_s7, 4  ;;  %s40_s10 = sshll.u32 %s583_s9, 4  ;;  %s20_s8 = int_to_ptr.vmem [resolvable:$true] %s19_s8  ;;  %s41_s10 = int_to_ptr.vmem [resolvable:$true] %s40_s10 }
  0x15   :  { %s507_s13 = scalar_lea.hbm %s691_s0, 128 }
  0x16   :  { %p508_p8 = scmp.ne.s32.totalorder %s691_s0, %s507_s13  ;;  %p511_p9 = scmp.lt.u32.totalorder %s507_s13, %s691_s0 }
  0x18   :  { %p513_p10 = pnand %p511_p9, %p508_p8 }
  0x1a   :  { %516 = shalt.err (!%p513_p10)
}
  0x1b   :  { %s517_s1 = scalar_lea.vmem %s20_s8, 128  ;;  %p522_p12 = scmp.lt.s32.totalorder %s20_s8, %s20_s8 }
  0x1c   :  { %p518_p11 = scmp.ne.s32.totalorder %s20_s8, %s517_s1  ;;  %p523_p13 = scmp.lt.s32.totalorder %s517_s1, %s517_s1 }
  0x1e   :  { %p524_p0 = por %p523_p13, %p522_p12 }
  0x20   :  { %p525_p1 = pnand %p524_p0, %p518_p11 }
  0x22   :  { %528 = shalt.err (!%p525_p1)
}
  0x23   :  { %22 = dma.hbm_to_vmem [thread:$0]  %s691_s0, 128, %s20_s8, [#allocation5]  }
  0x24   :  { %s529_s22 = scalar_lea.hbm %s693_s2, 2048 }
  0x25   :  { %p530_p2 = scmp.ne.s32.totalorder %s693_s2, %s529_s22  ;;  %p533_p3 = scmp.lt.u32.totalorder %s529_s22, %s693_s2 }
  0x27   :  { %p535_p4 = pnand %p533_p3, %p530_p2 }
  0x29   :  { %538 = shalt.err (!%p535_p4)
}
  0x2a   :  { %s539_s27 = scalar_lea.vmem %s41_s10, 2048  ;;  %p544_p6 = scmp.lt.s32.totalorder %s41_s10, %s41_s10 }
  0x2b   :  { %p540_p5 = scmp.ne.s32.totalorder %s41_s10, %s539_s27  ;;  %p545_p7 = scmp.lt.s32.totalorder %s539_s27, %s539_s27 }
  0x2d   :  { %p546_p8 = por %p545_p7, %p544_p6 }
  0x2f   :  { %p547_p9 = pnand %p546_p8, %p540_p5 }
  0x31   :  { %550 = shalt.err (!%p547_p9)
}
  0x32   :  { %s584_s0 = smov 128   ;;  %s585_s28 = smov 8  }
  0x33   :  { %46 = dma.hbm_to_vmem [thread:$0]  %s693_s2, 2048, %s41_s10, [#allocation8], %s584_s0, %s584_s0, %s585_s28  }
  0x34   :  { %573 = dma.done.wait [#allocation5], 128  }
  0x35   :  { %574 = vsyncadd [#allocation5], 4294967168 }
  0x36   :  { %575 = dma.done.wait [#allocation8], 3072  }
  0x37   :  { %576 = vsyncadd [#allocation8], 4294964224  ;;  %v586_v0 = vmov 0.0   ;;  %vm587_vm0 = vmmov 0   ;;  %v68_v1 = vld [vmem:[#allocation9] sm:$0xff]  ;;  %v69_v2 = vld [vmem:[#allocation9 + $0x8] sm:$0xff] }
  0x38   :  { %413 = vmatprep.subr.bf16.mxu1 %v586_v0  ;;  %393 = vmatprep.subr.bf16.mxu0 %v586_v0  ;;  %v70_v3 = vld [vmem:[#allocation9 + $0x10] sm:$0xff]  ;;  %v350_v4 = vclamps-f32 %v68_v1, 11.0  ;;  %v351_v5 = vclamps-f32 %v69_v2, 11.0  ;;  %v71_v6 = vld [vmem:[#allocation9 + $0x18] sm:$0xff]  ;;  %v72_v8 = vld [vmem:[#allocation9 + $0x20] sm:$0xff]  ;;  %s588_s9 = smov [#allocation10]  }
  0x39   :  { %429 = vmatprep.mubr.msk.bf16.mxu1 %vm587_vm0, %v586_v0  ;;  %409 = vmatprep.mubr.msk.bf16.mxu0 %vm587_vm0, %v586_v0  ;;  %v352_v7 = vclamps-f32 %v70_v3, 11.0  ;;  %v73_v9 = vld [vmem:[#allocation9 + $0x28] sm:$0xff]  ;;  %v353_v10 = vclamps-f32 %v71_v6, 11.0  ;;  %v354_v11 = vclamps-f32 %v72_v8, 11.0  ;;  %v74_v13 = vld [vmem:[#allocation9 + $0x30] sm:$0xff]  ;;  %v75_v14 = vld [vmem:[#allocation9 + $0x38] sm:$0xff] }
  0x3a   :  { %v355_v12 = vclamps-f32 %v73_v9, 11.0  ;;  %v443_v15 = vld [vmem:[#allocation7] sm:$0xff]   ;;  %v116_v16 = vmul.f32 1.442695, %v350_v4  ;;  %v118_v17 = vmul.f32 1.442695, %v351_v5 }
  0x3b   :  { %v120_v18 = vmul.f32 1.442695, %v352_v7  ;;  %v122_v19 = vmul.f32 1.442695, %v353_v10  ;;  %v124_v20 = vmul.f32 1.442695, %v354_v11  ;;  %394 = vmatpush3.bf16.msra.mxu0 %v443_v15 }
  0x3c   :  { %451 = vpow2.f32 %v116_v16  ;;  %v356_v21 = vclamps-f32 %v74_v13, 11.0  ;;  %395 = vmatprep.subr.bf16.mxu0 %v586_v0  ;;  %v126_v22 = vmul.f32 1.442695, %v355_v12  ;;  %v357_v23 = vclamps-f32 %v75_v14, 11.0  ;;  %v76_v24 = vld [vmem:[#allocation9 + $0x40] sm:$0xff]  ;;  %v77_v25 = vld [vmem:[#allocation9 + $0x48] sm:$0xff] }
  0x3d   :  { %453 = vpow2.f32 %v118_v17  ;;  %v444_v26 = vld [vmem:[#allocation7 + $0x8] sm:$0xff]   ;;  %v358_v28 = vclamps-f32 %v76_v24, 11.0  ;;  %v78_v29 = vld [vmem:[#allocation9 + $0x50] sm:$0xff]  ;;  %v79_v30 = vld [vmem:[#allocation9 + $0x58] sm:$0xff]  ;;  %v359_v32 = vclamps-f32 %v77_v25, 11.0  ;;  %s340_s10 = sshll.u32 %s588_s9, 4  ;;  %s341_s10 = int_to_ptr.vmem [resolvable:$true] %s340_s10 }
  0x3e   :  { %455 = vpow2.f32 %v120_v18  ;;  %v128_v27 = vmul.f32 1.442695, %v356_v21  ;;  %v130_v31 = vmul.f32 1.442695, %v357_v23  ;;  %v445_v33 = vld [vmem:[#allocation7 + $0x10] sm:$0xff]   ;;  %v360_v34 = vclamps-f32 %v78_v29, 11.0  ;;  %p556_p11 = scmp.lt.s32.totalorder %s341_s10, %s341_s10 }
  0x3f   :  { %457 = vpow2.f32 %v122_v19  ;;  %396 = vmatpush3.bf16.msra.mxu0 %v444_v26  ;;  %v361_v35 = vclamps-f32 %v79_v30, 11.0  ;;  %v132_v36 = vmul.f32 1.442695, %v358_v28  ;;  %v446_v37 = vld [vmem:[#allocation7 + $0x18] sm:$0xff]   ;;  %v134_v38 = vmul.f32 1.442695, %v359_v32 }
  0x40   :  { %459 = vpow2.f32 %v124_v20  ;;  %397 = vmatprep.subr.bf16.mxu0 %v586_v0  ;;  %v80_v39 = vld [vmem:[#allocation9 + $0x60] sm:$0xff]  ;;  %v81_v41 = vld [vmem:[#allocation9 + $0x68] sm:$0xff]  ;;  %v136_v43 = vmul.f32 1.442695, %v360_v34  ;;  %v82_v51 = vld [vmem:[#allocation9 + $0x70] sm:$0xff]  ;;  %s551_s11 = scalar_lea.vmem %s341_s10, 128 }
  0x41   :  { %461 = vpow2.f32 %v126_v22  ;;  %v138_v44 = vmul.f32 1.442695, %v361_v35  ;;  %v362_v47 = vclamps-f32 %v80_v39, 11.0  ;;  %v447_v48 = vld [vmem:[#allocation7 + $0x20] sm:$0xff]   ;;  %v363_v50 = vclamps-f32 %v81_v41, 11.0  ;;  %v83_v54 = vld [vmem:[#allocation9 + $0x78] sm:$0xff]  ;;  %p552_p10 = scmp.ne.s32.totalorder %s341_s10, %s551_s11  ;;  %p557_p12 = scmp.lt.s32.totalorder %s551_s11, %s551_s11 }
  0x42   :  { %463 = vpow2.f32 %v128_v27  ;;  %v364_v57 = vclamps-f32 %v82_v51, 11.0  ;;  %v448_v58 = vld [vmem:[#allocation7 + $0x28] sm:$0xff]   ;;  %v365_v60 = vclamps-f32 %v83_v54, 11.0  ;;  %v449_v2 = vld [vmem:[#allocation7 + $0x30] sm:$0xff]   ;;  %v450_v7 = vld [vmem:[#allocation7 + $0x38] sm:$0xff]  }
  0x43   :  { %398 = vmatpush3.bf16.msra.mxu0 %v445_v33  ;;  %465 = vpow2.f32 %v130_v31  ;;  %v140_v56 = vmul.f32 1.442695, %v362_v47  ;;  %v142_v59 = vmul.f32 1.442695, %v363_v50  ;;  %v67_v10 = vld [vmem:[#allocation4] sm:$0xff]  ;;  %p558_p13 = por %p557_p12, %p556_p11 }
  0x44   :  { %399 = vmatprep.subr.bf16.mxu0 %v586_v0  ;;  %467 = vpow2.f32 %v132_v36  ;;  %v144_v1 = vmul.f32 1.442695, %v364_v57  ;;  %v146_v3 = vmul.f32 1.442695, %v365_v60  ;;  %v149_v12 = vpack.c.bf16 %v67_v10, %v67_v10  ;;  %v374_v32 = vld [vmem:[%s694_s3] ss:$0 sm:$0xff] }
  0x45   :  { %469 = vpow2.f32 %v134_v38  ;;  %v257_v19 = vmul.f32 %v67_v10, %v67_v10  ;;  %v330_v34 = vld [vmem:[%s695_s4] sm:$0xff]  ;;  %p559_p0 = pnand %p558_p13, %p552_p10 }
  0x46   :  { %v452_v40 = vpop.eup %451  ;;  %471 = vpow2.f32 %v136_v43 }
  0x47   :  { %v454_v42 = vpop.eup %453  ;;  %400 = vmatpush3.bf16.msra.mxu0 %v446_v37  ;;  %473 = vpow2.f32 %v138_v44  ;;  %v258_v21 = vpack.c.bf16 %v257_v19, %v257_v19 }
  0x48   :  { %v456_v45 = vpop.eup %455  ;;  %v259_v46 = vpack.c.bf16 %v454_v42, %v452_v40  ;;  %401 = vmatprep.subr.bf16.mxu0 %v586_v0  ;;  %475 = vpow2.f32 %v140_v56 }
  0x49   :  { %v458_v49 = vpop.eup %457  ;;  %477 = vpow2.f32 %v142_v59 }
  0x4a   :  { %v460_v52 = vpop.eup %459  ;;  %414 = vmatpush3.bf16.msra.mxu1 %v259_v46  ;;  %v260_v53 = vpack.c.bf16 %v458_v49, %v456_v45  ;;  %479 = vpow2.f32 %v144_v1 }
  0x4b   :  { %v462_v55 = vpop.eup %461  ;;  %415 = vmatprep.subr.bf16.mxu1 %v586_v0  ;;  %402 = vmatpush3.bf16.msra.mxu0 %v447_v48  ;;  %481 = vpow2.f32 %v146_v3 }
  0x4c   :  { %403 = vmatprep.subr.bf16.mxu0 %v586_v0  ;;  %v464_v61 = vpop.eup %463  ;;  %v261_v62 = vpack.c.bf16 %v462_v55, %v460_v52 }
  0x4d   :  { %v466_v63 = vpop.eup %465 }
  0x4e   :  { %416 = vmatpush3.bf16.msra.mxu1 %v260_v53  ;;  %v468_v4 = vpop.eup %467  ;;  %v262_v5 = vpack.c.bf16 %v466_v63, %v464_v61 }
  0x4f   :  { %417 = vmatprep.subr.bf16.mxu1 %v586_v0  ;;  %404 = vmatpush3.bf16.msra.mxu0 %v448_v58  ;;  %v470_v6 = vpop.eup %469 }
  0x50   :  { %405 = vmatprep.subr.bf16.mxu0 %v586_v0  ;;  %v472_v8 = vpop.eup %471  ;;  %v263_v9 = vpack.c.bf16 %v470_v6, %v468_v4 }
  0x51   :  { %v474_v11 = vpop.eup %473 }
  0x52   :  { %418 = vmatpush3.bf16.msra.mxu1 %v261_v62  ;;  %v476_v13 = vpop.eup %475  ;;  %v264_v14 = vpack.c.bf16 %v474_v11, %v472_v8 }
  0x53   :  { %419 = vmatprep.subr.bf16.mxu1 %v586_v0  ;;  %406 = vmatpush3.bf16.msra.mxu0 %v449_v2  ;;  %v478_v15 = vpop.eup %477 }
  0x54   :  { %407 = vmatprep.subr.bf16.mxu0 %v586_v0  ;;  %v480_v16 = vpop.eup %479  ;;  %v265_v17 = vpack.c.bf16 %v478_v15, %v476_v13 }
  0x55   :  { %v482_v18 = vpop.eup %481 }
  0x56   :  { %420 = vmatpush3.bf16.msra.mxu1 %v262_v5  ;;  %v266_v20 = vpack.c.bf16 %v482_v18, %v480_v16 }
  0x57   :  { %421 = vmatprep.subr.bf16.mxu1 %v586_v0  ;;  %408 = vmatpush3.bf16.msra.mxu0 %v450_v7 }
  0x5a   :  { %422 = vmatpush3.bf16.msra.mxu1 %v263_v9  ;;  %410 = vmatmul.mubr.bf16.vlgmr.msra.gmra.mrb[0].mxu0 %v149_v12 }
  0x5b   :  { %423 = vmatprep.subr.bf16.mxu1 %v586_v0 }
  0x5e   :  { %424 = vmatpush3.bf16.msra.mxu1 %v264_v14 }
  0x5f   :  { %425 = vmatprep.subr.bf16.mxu1 %v586_v0 }
  0x62   :  { %426 = vmatpush3.bf16.msra.mxu1 %v265_v17 }
  0x63   :  { %427 = vmatprep.subr.bf16.mxu1 %v586_v0 }
  0x66   :  { %428 = vmatpush3.bf16.msra.mxu1 %v266_v20 }
  0x69   :  { %430 = vmatmul.mubr.bf16.vlgmr.msra.gmra.mrb[0].mxu1 %v258_v21 }
 0x12d   :  { %v248_v22 = vpop.f32.mrb[0].mxu0 }
 0x12e   :  { %v411_v23 = vpop.f32.mrb[1].mxu0  ;;  %v320_v35 = vadd.f32 %v374_v32, %v248_v22 }
 0x12f   :  { %v251_v24 = vpop.f32.mrb[2].mxu0 }
 0x130   :  { %v412_v25 = vpop.f32.mrb[3].mxu0 }
 0x13c   :  { %v301_v26 = vpop.f32.mrb[0].mxu1 }
 0x13d   :  { %v322_v27 = vadd.f32 1e-08, %v301_v26  ;;  %v431_v28 = vpop.f32.mrb[1].mxu1 }
 0x13e   :  { %v304_v29 = vpop.f32.mrb[2].mxu1 }
 0x13f   :  { %483 = vrsqrt.f32 %v322_v27  ;;  %v432_v30 = vpop.f32.mrb[3].mxu1  ;;  %vm325_vm1 = vcmp.eq.f32.partialorder %v322_v27, inf  ;;  %v328_v0 = vand.u32 2147483648, %v322_v27  ;;  %vm327_vm2 = vcmp.eq.f32.partialorder %v322_v27, 0.0 }
 0x149   :  { %v484_v31 = vpop.eup %483 }
 0x14a   :  { %v324_v33 = vmul.f32 %v484_v31, %v322_v27 }
 0x14c   :  { %v326_v36 = vsel %vm325_vm1, %v322_v27, %v324_v33 }
 0x14d   :  { %v329_v37 = vsel %vm327_vm2, %v328_v0, %v326_v36 }
 0x14e   :  { %v331_v38 = vmul.f32 %v330_v34, %v329_v37 }
 0x150   :  { %v332_v39 = vadd.f32 %v331_v38, %v320_v35 }
 0x152   :  { %333 = vst [vmem:[#allocation10] sm:$0xff] %v332_v39 }
 0x153   :  { %562 = shalt.err (!%p559_p0)
}
 0x154   :  { %s563_s4 = scalar_lea.hbm %s696_s5, 128 }
 0x155   :  { %p564_p1 = scmp.ne.s32.totalorder %s696_s5, %s563_s4  ;;  %p567_p2 = scmp.lt.u32.totalorder %s563_s4, %s696_s5 }
 0x157   :  { %p569_p3 = pnand %p567_p2, %p564_p1 }
 0x159   :  { %572 = shalt.err (!%p569_p3)
}
 0x15a   :  { %343 = dma.vmem_to_hbm [thread:$0]  %s341_s10, 128, %s696_s5, [#allocation6]  }
 0x15b   :  { %577 = dma.done.wait [#allocation6], 128  }
 0x15c   :  { %578 = vsyncadd [#allocation6], 4294967168 }
 0x15d   :  { %347 = vsyncpa [#allocation5], 1 }
 0x15e   :  { %348 = vsyncpa [#allocation8], 1 }
 0x15f   :  { %349 = vsyncpa [#allocation6], 1 }

</bundles_post_ra>
